<compile_context>
chip_gen: v6e
topology: v6e:2x2x1
jax: 0.10.0
libtpu: 0.0.40
codegen_flags: <defaults>
</compile_context>

<pallas_src>
import functools

import jax
import jax.numpy as jnp
from jax import lax
from jax.experimental import pallas as pl
from jax.experimental.pallas import tpu as pltpu


def _mae_loss_kernel(target_ref, pred_ref, mask_ref, mean_ref, inv_std_ref,
                     part_ref, *, norm_pix_loss, d, tm, m_rows):
    # Pixel normalization: x/255, then (x - mean) * (1/std) per channel
    # (mean / 1/std vectors are tiled to the channel-fastest patch layout).
    t = target_ref[...].astype(jnp.float32) * (1.0 / 255.0)
    t = (t - mean_ref[...]) * inv_std_ref[...]

    if norm_pix_loss:
        mu = jnp.mean(t, axis=-1, keepdims=True)
        # torch.Tensor.var defaults to unbiased (divide by D - 1).
        var = jnp.sum((t - mu) ** 2, axis=-1, keepdims=True) * (1.0 / (d - 1))
        t = (t - mu) * lax.rsqrt(var + 1e-6)

    diff = pred_ref[...].astype(jnp.float32) - t
    m = mask_ref[...].astype(jnp.float32)                 # (tm, 1)
    sq = diff * diff * m                                  # (tm, d)

    # Rows past the end of the array in the last (partial) tile contain
    # unspecified data; zero their contribution instead of padding in HBM.
    row = lax.broadcasted_iota(jnp.int32, (tm, 1), 0)
    valid = row < (m_rows - pl.program_id(0) * tm)
    sq = jnp.where(valid, sq, 0.0)

    # Per-tile, per-lane partial sums; the tiny cross-lane / cross-tile
    # reduction and the /D, /mask.sum() happen outside the kernel so the grid
    # axis stays fully parallel (2 TensorCores on v7x).
    part_ref[...] = jnp.sum(sq, axis=0, keepdims=True).reshape(1, 1, d)


def mae_loss(imgs, pred, mask, *, p, norm_pix_loss, tile_rows=None):
    """JAX/Pallas equivalent of MaeLoss(norm_pix_loss, p).forward(imgs, pred, mask)."""
    n, c, h_img, w_img = imgs.shape
    assert c == 3 and h_img == w_img and h_img % p == 0
    h = w = h_img // p
    l = h * w
    d = p * p * 3
    assert pred.shape == (n, l, d)
    assert mask.shape == (n, l)

    # --- layout glue: patchify in the image's NATIVE dtype (no upcast).
    # Last-dim ordering is (patch_row, patch_col, channel), channel fastest,
    # matching torch.permute(0, 2, 4, 3, 5, 1).
    # TODO(synk): fuse the patchify transpose into the kernel (grid over
    # (n, h, w) pulling (3, p, p) image tiles directly) to remove this extra
    # XLA HBM pass over the image data.
    x = imgs.reshape(n, 3, h, p, w, p)
    x = jnp.transpose(x, (0, 2, 4, 3, 5, 1))              # (N, h, w, p, p, 3)
    target_raw = x.reshape(n * l, d)                      # native dtype
    pred2 = pred.reshape(n * l, d)                        # native dtype (bf16 ok)
    mask2 = mask.reshape(n * l, 1).astype(jnp.float32)

    m_rows = n * l

    # Row-tile size: as large as fits a ~24 MiB double-buffer budget
    # (2 buffers x tm x row_bytes), capped at 2048 rows.  32-row granularity
    # covers f32 / bf16 / int8 sublane packing.  Safe on v7x's smaller VMEM.
    row_bytes = d * (target_raw.dtype.itemsize + pred2.dtype.itemsize) + 4
    if tile_rows is None:
        tile_rows = (12 * 1024 * 1024) // max(row_bytes, 1)
    tm = max(32, (min(int(tile_rows), 2048) // 32) * 32)
    tm = min(tm, ((m_rows + 31) // 32) * 32)              # don't exceed problem
    num_tiles = (m_rows + tm - 1) // tm

    # Channel mean / reciprocal std tiled to the channel-fastest patch layout.
    mean_vec = jnp.tile(
        jnp.array([0.485, 0.456, 0.406], jnp.float32), p * p).reshape(1, d)
    inv_std_vec = jnp.tile(
        1.0 / jnp.array([0.229, 0.224, 0.225], jnp.float32), p * p).reshape(1, d)

    kernel = functools.partial(_mae_loss_kernel, norm_pix_loss=norm_pix_loss,
                               d=d, tm=tm, m_rows=m_rows)

    vmem_limit = int(min(48 << 20, max(32 << 20, 3 * tm * row_bytes)))

    parts = pl.pallas_call(
        kernel,
        out_shape=jax.ShapeDtypeStruct((num_tiles, 1, d), jnp.float32),
        grid_spec=pltpu.PrefetchScalarGridSpec(
            num_scalar_prefetch=0,
            grid=(num_tiles,),
            in_specs=[
                pl.BlockSpec((tm, d), lambda i: (i, 0)),  # raw patchified pixels
                pl.BlockSpec((tm, d), lambda i: (i, 0)),  # pred
                pl.BlockSpec((tm, 1), lambda i: (i, 0)),  # mask column
                pl.BlockSpec((1, d), lambda i: (0, 0)),   # channel mean (tiled)
                pl.BlockSpec((1, d), lambda i: (0, 0)),   # channel 1/std (tiled)
            ],
            out_specs=pl.BlockSpec((1, 1, d), lambda i: (i, 0, 0)),
        ),
        compiler_params=pltpu.CompilerParams(
            dimension_semantics=("parallel",),
            vmem_limit_bytes=vmem_limit),
    )(target_raw, pred2, mask2, mean_vec, inv_std_vec)

    # Tiny final reduction in plain JAX (per-patch mean is the /d factor).
    num = jnp.sum(parts) * (1.0 / d)
    den = jnp.sum(mask.astype(jnp.float32))
    return num / den


def _reference_loss(imgs, pred, mask, *, p, norm_pix_loss):
    """Pure-JAX reference mirroring the PyTorch module, for a sanity check."""
    mean = jnp.array([0.485, 0.456, 0.406], jnp.float32).reshape(1, 3, 1, 1)
    var = jnp.array([0.229, 0.224, 0.225], jnp.float32).reshape(1, 3, 1, 1)
    x = imgs.astype(jnp.float32) / 255.0
    x = (x - mean) / var
    n, _, hh, _ = x.shape
    h = w = hh // p
    x = x.reshape(n, 3, h, p, w, p)
    x = jnp.transpose(x, (0, 2, 4, 3, 5, 1)).reshape(n, h * w, p * p * 3)
    target = x
    if norm_pix_loss:
        mu = target.mean(axis=-1, keepdims=True)
        d = target.shape[-1]
        v = jnp.sum((target - mu) ** 2, axis=-1, keepdims=True) / (d - 1)
        target = (target - mu) / jnp.sqrt(v + 1e-6)
    loss = (pred.astype(jnp.float32) - target) ** 2
    loss = loss.mean(axis=-1)
    return (loss * mask).sum() / mask.sum()


if __name__ == "__main__":
    key = jax.random.PRNGKey(0)
    k1, k2, k3 = jax.random.split(key, 3)

    N, H, W, P = 2, 16, 16, 4
    L = (H // P) * (W // P)            # 16 patches
    D = P * P * 3                      # 48

    imgs = jax.random.uniform(k1, (N, 3, H, W), jnp.float32, 0.0, 255.0)
    pred = jax.random.normal(k2, (N, L, D), jnp.float32).astype(jnp.bfloat16)
    mask = (jax.random.uniform(k3, (N, L)) < 0.75).astype(jnp.float32)

    for npix in (False, True):
        loss = mae_loss(imgs, pred, mask, p=P, norm_pix_loss=npix)
        loss = jax.block_until_ready(loss)
        ref = _reference_loss(imgs, pred, mask, p=P, norm_pix_loss=npix)
        assert jnp.isfinite(loss), "non-finite loss"
        assert jnp.allclose(loss, ref, rtol=1e-4, atol=1e-5), (npix, loss, ref)

    print("KERNEL_OK")
</pallas_src>

<mosaic_0001>
module attributes {stable_mosaic.version = 11 : i64} {
  func.func @_mae_loss_kernel(%arg0: i32, %arg1: memref<32x48xf32, #tpu.memory_space<vmem>>, %arg2: memref<32x48xbf16, #tpu.memory_space<vmem>>, %arg3: memref<32x1xf32, #tpu.memory_space<vmem>>, %arg4: memref<1x48xf32, #tpu.memory_space<vmem>>, %arg5: memref<1x48xf32, #tpu.memory_space<vmem>>, %arg6: memref<1x1x48xf32, #tpu.memory_space<vmem>>) attributes {dimension_semantics = [#tpu.dimension_semantics<parallel>], iteration_bounds = array<i64: 1>, scalar_prefetch = 0 : i64, scratch_operands = 0 : i64, tpu.core_type = #tpu.core_type<tc>, window_params = [{transform_indices = @transform_0, window_bounds = array<i64: 32, 48>}, {transform_indices = @transform_1, window_bounds = array<i64: 32, 48>}, {transform_indices = @transform_2, window_bounds = array<i64: 32, 1>}, {pipeline_mode = #tpu.pipeline_mode<synchronous>, transform_indices = @transform_3, window_bounds = array<i64: 1, 48>}, {pipeline_mode = #tpu.pipeline_mode<synchronous>, transform_indices = @transform_4, window_bounds = array<i64: 1, 48>}, {transform_indices = @transform_5, window_bounds = array<i64: 1, 1, 48>}]} {
    %c0 = arith.constant 0 : index
    %c0_0 = arith.constant 0 : index
    %0 = vector.load %arg1[%c0, %c0_0] : memref<32x48xf32, #tpu.memory_space<vmem>>, vector<32x48xf32>
    %cst = arith.constant 0.00392156886 : f32
    %1 = vector.broadcast %cst : f32 to vector<32x48xf32>
    %2 = arith.mulf %0, %1 : vector<32x48xf32>
    %c0_1 = arith.constant 0 : index
    %c0_2 = arith.constant 0 : index
    %3 = vector.load %arg4[%c0_1, %c0_2] : memref<1x48xf32, #tpu.memory_space<vmem>>, vector<1x48xf32>
    %4 = vector.broadcast %3 : vector<1x48xf32> to vector<32x48xf32>
    %5 = arith.subf %2, %4 : vector<32x48xf32>
    %c0_3 = arith.constant 0 : index
    %c0_4 = arith.constant 0 : index
    %6 = vector.load %arg5[%c0_3, %c0_4] : memref<1x48xf32, #tpu.memory_space<vmem>>, vector<1x48xf32>
    %7 = vector.broadcast %6 : vector<1x48xf32> to vector<32x48xf32>
    %8 = arith.mulf %5, %7 : vector<32x48xf32>
    %c0_5 = arith.constant 0 : index
    %c0_6 = arith.constant 0 : index
    %9 = vector.load %arg2[%c0_5, %c0_6] : memref<32x48xbf16, #tpu.memory_space<vmem>>, vector<32x48xbf16>
    %10 = arith.extf %9 : vector<32x48xbf16> to vector<32x48xf32>
    %11 = arith.subf %10, %8 : vector<32x48xf32>
    %c0_7 = arith.constant 0 : index
    %c0_8 = arith.constant 0 : index
    %12 = vector.load %arg3[%c0_7, %c0_8] : memref<32x1xf32, #tpu.memory_space<vmem>>, vector<32x1xf32>
    %13 = arith.mulf %11, %11 : vector<32x48xf32>
    %14 = vector.broadcast %12 : vector<32x1xf32> to vector<32x48xf32>
    %15 = arith.mulf %13, %14 : vector<32x48xf32>
    %16 = tpu.iota {dimensions = array<i32: 0>} : vector<32x1xi32>
    %c32_i32 = arith.constant 32 : i32
    %17 = arith.muli %arg0, %c32_i32 : i32
    %c32_i32_9 = arith.constant 32 : i32
    %18 = arith.subi %c32_i32_9, %17 : i32
    %19 = vector.broadcast %18 : i32 to vector<32x1xi32>
    %20 = arith.cmpi slt, %16, %19 : vector<32x1xi32>
    %cst_10 = arith.constant 0.000000e+00 : f32
    %21 = vector.shape_cast %20 : vector<32x1xi1> to vector<32x1xi1>
    %22 = vector.broadcast %21 : vector<32x1xi1> to vector<32x48xi1>
    %23 = vector.broadcast %cst_10 : f32 to vector<32x48xf32>
    %24 = arith.select %22, %15, %23 : vector<32x48xi1>, vector<32x48xf32>
    %cst_11 = arith.constant dense<0.000000e+00> : vector<48xf32>
    %25 = vector.multi_reduction <add>, %24, %cst_11 [0] : vector<32x48xf32> to vector<48xf32>
    %26 = vector.shape_cast %25 : vector<48xf32> to vector<1x48xf32>
    %27 = vector.shape_cast %26 : vector<1x48xf32> to vector<1x1x48xf32>
    %c0_12 = arith.constant 0 : index
    %c0_13 = arith.constant 0 : index
    %c0_14 = arith.constant 0 : index
    %28 = vector.load %arg6[%c0_12, %c0_13, %c0_14] : memref<1x1x48xf32, #tpu.memory_space<vmem>>, vector<1x1x48xf32>
    tpu.vector_store %arg6[%c0_12, %c0_13, %c0_14], %27 {strides = array<i32>} : memref<1x1x48xf32, #tpu.memory_space<vmem>>, vector<1x1x48xf32>,
    return
  }
  func.func @transform_0(%arg0: i32) -> (i32, i32) {
    %c0_i32 = arith.constant 0 : i32
    %c0_i32_0 = arith.constant 0 : i32
    return %arg0, %c0_i32 : i32, i32
  }
  func.func @transform_1(%arg0: i32) -> (i32, i32) {
    %c0_i32 = arith.constant 0 : i32
    %c0_i32_0 = arith.constant 0 : i32
    return %arg0, %c0_i32 : i32, i32
  }
  func.func @transform_2(%arg0: i32) -> (i32, i32) {
    %c0_i32 = arith.constant 0 : i32
    %c0_i32_0 = arith.constant 0 : i32
    return %arg0, %c0_i32 : i32, i32
  }
  func.func @transform_3(%arg0: i32) -> (i32, i32) {
    %c0_i32 = arith.constant 0 : i32
    %c0_i32_0 = arith.constant 0 : i32
    %c0_i32_1 = arith.constant 0 : i32
    return %c0_i32, %c0_i32_0 : i32, i32
  }
  func.func @transform_4(%arg0: i32) -> (i32, i32) {
    %c0_i32 = arith.constant 0 : i32
    %c0_i32_0 = arith.constant 0 : i32
    %c0_i32_1 = arith.constant 0 : i32
    return %c0_i32, %c0_i32_0 : i32, i32
  }
  func.func @transform_5(%arg0: i32) -> (i32, i32, i32) {
    %c0_i32 = arith.constant 0 : i32
    %c0_i32_0 = arith.constant 0 : i32
    %c0_i32_1 = arith.constant 0 : i32
    return %arg0, %c0_i32, %c0_i32_0 : i32, i32, i32
  }
}

</mosaic_0001>

<bundles_post_ra>
// kernel: tpu_custom_call.1
= control target key start
LH: loop header
LB: loop body
LE: loop exit
PB: predicated region body
PF: predicated region fallthrough
CT: control target
= control target key end

     0   :  { %10 = vsyncpa [#allocation3], 0  ;;  %s297_s0 = inlined_call_operand.vmem [shape: f32[32,48], index: 0, kind: input, shape index: {}]   ;;  %s298_s1 = inlined_call_operand.hbm [shape: bf16[32,48], index: 1, kind: input, shape index: {}]   ;;  %s299_s2 = inlined_call_operand.vmem [shape: f32[32,1], index: 2, kind: input, shape index: {}]   ;;  %s300_s3 = inlined_call_operand.vmem [shape: f32[1,48], index: 3, kind: input, shape index: {}]   ;;  %s301_s4 = inlined_call_operand.vmem [shape: f32[1,48], index: 4, kind: input, shape index: {}]   ;;  %s302_s5 = inlined_call_operand.hbm [shape: f32[1,1,48], index: 5, kind: output, shape index: {}]  }
   0x1   :  { %11 = vsyncpa [#allocation4], 0  ;;  %s226_s18 = smov [#allocation2]  }
   0x2   :  { %s19_s19 = sshll.u32 %s226_s18, 4  ;;  %s20_s19 = int_to_ptr.vmem [resolvable:$true] %s19_s19 }
   0x3   :  { %s190_s20 = scalar_lea.vmem %s20_s19, 256  ;;  %p195_p1 = scmp.lt.s32.totalorder %s20_s19, %s20_s19 }
   0x4   :  { %p191_p0 = scmp.ne.s32.totalorder %s20_s19, %s190_s20  ;;  %p196_p2 = scmp.lt.s32.totalorder %s190_s20, %s190_s20 }
   0x6   :  { %p197_p3 = por %p196_p2, %p195_p1 }
   0x8   :  { %p198_p4 = pnand %p197_p3, %p191_p0 }
   0xa   :  { %201 = shalt.err (!%p198_p4)
}
   0xb   :  { %s227_s21 = smov 64   ;;  %s228_s22 = smov 4  }
   0xc   :  { %25 = dma.hbm_to_vmem [thread:$0]  %s298_s1, 256, %s20_s19, [#allocation3], %s227_s21, %s227_s21, %s228_s22  }
   0xd   :  { %222 = dma.done.wait [#allocation3], 256  }
   0xe   :  { %223 = vsyncadd [#allocation3], 4294967040  ;;  %v229_v0 = vmov 0   ;;  %v79_v1 = vld [vmem:[%s299_s2 + $0x10] sm:$0xff]  ;;  %v77_v2 = vld [vmem:[%s299_s2] sm:$0xff]  ;;  %vm133_vm0 = vcmask 392192  }
   0xf   :  { %181 = vset.pattern.permute.xlu1 %v229_v0  ;;  %180 = vset.pattern.permute.xlu0 %v229_v0  ;;  %v80_v3 = vld [vmem:[%s299_s2 + $0x18] sm:$0xff]  ;;  %v78_v4 = vld [vmem:[%s299_s2 + $0x8] sm:$0xff]  ;;  %v35_v5 = vld [vmem:[%s297_s0] sm:$0xff]  ;;  %vm147_vm1 = vcmask 385024  }
  0x10   :  { %97 = vperm.xlu1 %181, %v79_v1   ;;  %87 = vperm.xlu0 %180, %v77_v2   ;;  %v37_v6 = vld [vmem:[%s297_s0 + $0x10] sm:$0xff]  ;;  %v36_v7 = vld [vmem:[%s297_s0 + $0x8] sm:$0xff]  ;;  %v39_v8 = vmul.f32 0.003921569, %v35_v5  ;;  %v164_v9 = vld [vmem:[%s300_s3] ss:$0 sm:$0xff] }
  0x11   :  { %v38_v10 = vld [vmem:[%s297_s0 + $0x18] sm:$0xff]  ;;  %v41_v11 = vmul.f32 0.003921569, %v37_v6  ;;  %v40_v12 = vmul.f32 0.003921569, %v36_v7  ;;  %v167_v16 = vld [vmem:[#allocation2] sm:$0xff]  }
  0x12   :  { %v50_v13 = vsub.f32 %v39_v8, %v164_v9  ;;  %v42_v14 = vmul.f32 0.003921569, %v38_v10  ;;  %v165_v15 = vld [vmem:[%s301_s4] ss:$0 sm:$0xff]  ;;  %v174_v19 = vld [vmem:[#allocation2 + $0x8] sm:$0xff]   ;;  %v168_v21 = vunpack.c.l.bf16 %v167_v16  ;;  %v169_v26 = vunpack.c.h.bf16 %v167_v16  ;;  %s230_s0 = smov [#allocation5]  }
  0x13   :  { %v52_v17 = vsub.f32 %v41_v11, %v164_v9  ;;  %v51_v18 = vsub.f32 %v40_v12, %v164_v9  ;;  %v172_v24 = vunpack.c.l.bf16 %v174_v19  ;;  %v173_v29 = vunpack.c.h.bf16 %v174_v19  ;;  %s155_s3 = sshll.u32 %s230_s0, 4  ;;  %s156_s3 = int_to_ptr.vmem [resolvable:$true] %s155_s3 }
  0x14   :  { %102 = vperm.xlu1 %181, %v80_v3   ;;  %92 = vperm.xlu0 %180, %v78_v4   ;;  %v61_v20 = vmul.f32 %v165_v15, %v50_v13  ;;  %v53_v22 = vsub.f32 %v42_v14, %v164_v9  ;;  %s202_s4 = scalar_lea.vmem %s156_s3, 16  ;;  %s206_s18 = scalar_lea.vmem %s156_s3, 32 }
  0x15   :  { %v63_v23 = vmul.f32 %v165_v15, %v52_v17  ;;  %v62_v25 = vmul.f32 %v165_v15, %v51_v18  ;;  %p203_p5 = scmp.ne.s32.totalorder %s156_s3, %s202_s4  ;;  %p207_p6 = scmp.lt.s32.totalorder %s156_s3, %s156_s3 }
  0x16   :  { %v73_v27 = vsub.f32 %v168_v21, %v61_v20  ;;  %v64_v28 = vmul.f32 %v165_v15, %v53_v22  ;;  %p208_p7 = scmp.lt.s32.totalorder %s206_s18, %s202_s4 }
  0x17   :  { %v75_v30 = vsub.f32 %v172_v24, %v63_v23  ;;  %v74_v31 = vsub.f32 %v169_v26, %v62_v25 }
  0x18   :  { %v81_v32 = vmul.f32 %v73_v27, %v73_v27  ;;  %v76_v33 = vsub.f32 %v173_v29, %v64_v28  ;;  %p209_p8 = por %p208_p7, %p207_p6 }
  0x19   :  { %v83_v36 = vmul.f32 %v75_v30, %v75_v30  ;;  %v82_v37 = vmul.f32 %v74_v31, %v74_v31 }
  0x1a   :  { %v84_v39 = vmul.f32 %v76_v33, %v76_v33  ;;  %p210_p9 = pnand %p209_p8, %p203_p5 }
  0x8b   :  { %v98_v34 = vpop.permute.xlu1 %97  ;;  %v88_v35 = vpop.permute.xlu0 %87 }
  0x8c   :  { %v105_v38 = vmul.f32 %v88_v35, %v81_v32  ;;  %v107_v42 = vmul.f32 %v98_v34, %v83_v36 }
  0x8e   :  { %v134_v44 = vsel %vm133_vm0, %v105_v38, 0.0  ;;  %v137_v48 = vsel %vm133_vm0, %v107_v42, 0.0 }
  0x8f   :  { %v103_v40 = vpop.permute.xlu1 %102  ;;  %v93_v41 = vpop.permute.xlu0 %92 }
  0x90   :  { %v106_v43 = vmul.f32 %v93_v41, %v82_v37  ;;  %v108_v45 = vmul.f32 %v103_v40, %v84_v39 }
  0x92   :  { %v135_v46 = vsel %vm133_vm0, %v106_v43, 0.0  ;;  %v139_v50 = vsel %vm133_vm0, %v108_v45, 0.0 }
  0x93   :  { %v136_v47 = vadd.f32 %v135_v46, %v134_v44 }
  0x95   :  { %v138_v49 = vadd.f32 %v137_v48, %v136_v47 }
  0x97   :  { %v140_v51 = vadd.f32 %v139_v50, %v138_v49 }
  0x99   :  { %v141_v52 = vrot.slane %v140_v51, 4 }
  0x9b   :  { %v142_v53 = vadd.f32 %v141_v52, %v140_v51 }
  0x9d   :  { %v143_v54 = vrot.slane %v142_v53, 2 }
  0x9f   :  { %v144_v55 = vadd.f32 %v143_v54, %v142_v53 }
  0xa1   :  { %v145_v56 = vrot.slane %v144_v55, 1 }
  0xa3   :  { %v146_v57 = vadd.f32 %v145_v56, %v144_v55 }
  0xa5   :  { %148 = vst.msk [vmem:[#allocation5] sm:$0x1] %vm147_vm1, %v146_v57 }
  0xa6   :  { %213 = shalt.err (!%p210_p9)
}
  0xa7   :  { %158 = dma.vmem_to_hbm [thread:$0]  %s156_s3, 16, %s302_s5, [#allocation4]  }
  0xa8   :  { %224 = dma.done.wait [#allocation4], 16  }
  0xa9   :  { %225 = vsyncadd [#allocation4], 4294967280 }
  0xaa   :  { %162 = vsyncpa [#allocation3], 1 }
  0xab   :  { %163 = vsyncpa [#allocation4], 1 }

</bundles_post_ra>
